<compile_context>
chip_gen: v7x
topology: tpu7x:2x2x1
jax: 0.10.0
libtpu: 0.0.40
codegen_flags: <defaults>
</compile_context>

<pallas_src>
import math

import jax
import jax.numpy as jnp
from jax import lax
from jax.experimental import pallas as pl
from jax.experimental.pallas import tpu as pltpu

MIN_SCORE = -1e9  # value used by the reference for masked positions


def _round_up(x, m):
    return (x + m - 1) // m * m


def _vmem_limit_bytes():
    # ~3/4 of physical VMEM: ~48 MiB on v7x (64 MiB), 96 MiB on v5e/v6e (128 MiB).
    try:
        cap = pltpu.get_tpu_info().vmem_capacity_bytes
        return int(min(cap * 3 // 4, 96 * 1024 * 1024))
    except Exception:
        return None  # fall back to the compiler default


def _pick_block_b(B, tq, sk, d, dv, itemsize):
    """Block several batch elements per grid step when per-batch work is tiny
    (amortizes per-step pipeline overhead), bounded by a conservative VMEM budget."""
    budget = 24 * 1024 * 1024
    for bt in (8, 4, 2, 1):
        if B % bt:
            continue
        per_step = bt * (
            2 * itemsize * (tq * d + sk * (d + dv) + sk + tq * dv + tq * sk)  # dbl-buffered I/O
            + 3 * 4 * tq * sk                                                 # f32 softmax temps
        )
        if per_step <= budget:
            return bt
    return 1


def _global_attention_kernel(q_ref, k_ref, v_ref, bias_ref, out_ref, probs_ref):
    head_dim = q_ref.shape[-1]
    scale = 1.0 / math.sqrt(head_dim)

    # Fold 1/sqrt(d) into Q: Sq*D multiplies instead of Sq*Sk on the scores.
    q = q_ref[...] * scale          # [BT, TQ, D]
    k = k_ref[...]                  # [BT, Sk, D]
    v = v_ref[...]                  # [BT, Sk, Dv]
    bias = bias_ref[...]            # [BT, 1, Sk]   (0.0 or MIN_SCORE)

    # scores = (Q/sqrt(d)) @ K^T: contract the LAST axis of both operands so the
    # MXU consumes K in its native layout (no XLU transpose), f32 accumulation.
    scores = lax.dot_general(
        q, k, (((2,), (2,)), ((0,), (0,))),
        preferred_element_type=jnp.float32,
    ) + bias                        # [BT, TQ, Sk]

    # Numerically-stable softmax; denominator reciprocal goes to the EUP slot.
    m = jnp.max(scores, axis=-1, keepdims=True)
    e = jnp.exp(scores - m)
    denom = jnp.sum(e, axis=-1, keepdims=True)
    probs = e * pl.reciprocal(denom, approx=True)

    # TODO(synk): nn.Dropout(p=0.1) is identity in eval mode; training-mode
    # stochastic dropout (pltpu.prng_seed / prng_random_bits) intentionally not applied.

    out = lax.dot_general(
        probs.astype(v.dtype), v, (((2,), (1,)), ((0,), (0,))),
        preferred_element_type=jnp.float32,
    )                               # [BT, TQ, Dv]

    out_ref[...] = out.astype(out_ref.dtype)
    probs_ref[...] = probs.astype(probs_ref.dtype)


def global_attention(query, key, value, mask=None, *, block_q=256):
    """Pallas GlobalAttention.forward: returns (attn_output, attention_probs)."""
    B, Sq, D = query.shape
    Bk, Sk, Dk = key.shape
    Bv, Skv, Dv = value.shape
    assert Dk == D and Bk == B and Bv == B and Skv == Sk

    # --- additive mask bias (replaces int mask load + compare + select in-kernel) ---
    if mask is None:
        bias = jnp.zeros((B, 1, Sk), dtype=jnp.float32)
    else:
        bias = jnp.where(mask[:, None, :] == 0,
                         jnp.float32(MIN_SCORE), jnp.float32(0.0))

    # --- pad Sk to a lane-dense multiple of 128; padded keys get MIN_SCORE bias ---
    Sk_p = _round_up(Sk, 128)
    if Sk_p != Sk:
        key = jnp.pad(key, ((0, 0), (0, Sk_p - Sk), (0, 0)))
        value = jnp.pad(value, ((0, 0), (0, Sk_p - Sk), (0, 0)))
        bias = jnp.pad(bias, ((0, 0), (0, 0), (0, Sk_p - Sk)),
                       constant_values=MIN_SCORE)

    # --- query tiling (bounds per-step VMEM; Sq padded to a tile multiple) ---
    tq = min(block_q, _round_up(Sq, 8))
    Sq_p = _round_up(Sq, tq)
    if Sq_p != Sq:
        query = jnp.pad(query, ((0, 0), (0, Sq_p - Sq), (0, 0)))

    itemsize = jnp.dtype(query.dtype).itemsize
    bt = _pick_block_b(B, tq, Sk_p, D, Dv, itemsize)

    grid = (B // bt, Sq_p // tq)

    cost = pl.CostEstimate(
        flops=int(2 * B * Sq_p * Sk_p * (D + Dv)),
        transcendentals=int(B * Sq_p * Sk_p),
        bytes_accessed=int(itemsize * (query.size + key.size + value.size
                                       + B * Sq_p * (Dv + Sk_p))
                           + 4 * bias.size),
    )

    out_p, probs_p = pl.pallas_call(
        _global_attention_kernel,
        out_shape=(
            jax.ShapeDtypeStruct((B, Sq_p, Dv), query.dtype),
            # probs follow the input dtype (matches torch; bf16 inputs -> bf16 probs traffic)
            jax.ShapeDtypeStruct((B, Sq_p, Sk_p), query.dtype),
        ),
        grid_spec=pltpu.PrefetchScalarGridSpec(
            num_scalar_prefetch=0,
            grid=grid,
            in_specs=[
                pl.BlockSpec((bt, tq, D), lambda b, i: (b, i, 0)),
                # K / V / bias index_maps ignore the query-tile index -> stay
                # resident in VMEM across the inner grid axis (re-DMA only when b changes).
                pl.BlockSpec((bt, Sk_p, D), lambda b, i: (b, 0, 0)),
                pl.BlockSpec((bt, Sk_p, Dv), lambda b, i: (b, 0, 0)),
                pl.BlockSpec((bt, 1, Sk_p), lambda b, i: (b, 0, 0)),
            ],
            out_specs=[
                pl.BlockSpec((bt, tq, Dv), lambda b, i: (b, i, 0)),
                pl.BlockSpec((bt, tq, Sk_p), lambda b, i: (b, i, 0)),
            ],
        ),
        compiler_params=pltpu.CompilerParams(
            dimension_semantics=("parallel", "parallel"),
            vmem_limit_bytes=_vmem_limit_bytes(),
        ),
        cost_estimate=cost,
    )(query, key, value, bias)

    # Strip padding.
    return out_p[:, :Sq, :], probs_p[:, :Sq, :Sk]


def _reference(query, key, value, mask=None):
    d = query.shape[-1]
    scores = jnp.einsum("bqd,bkd->bqk", query, key) / math.sqrt(d)
    if mask is not None:
        scores = jnp.where(mask[:, None, :] == 0, MIN_SCORE, scores)
    probs = jax.nn.softmax(scores, axis=-1)
    return jnp.einsum("bqk,bkd->bqd", probs, value), probs


if __name__ == "__main__":
    key0 = jax.random.PRNGKey(0)
    kq, kk, kv, km = jax.random.split(key0, 4)

    B, Sq, Sk, D = 2, 8, 8, 32
    q = jax.random.normal(kq, (B, Sq, D), dtype=jnp.float32)
    k = jax.random.normal(kk, (B, Sk, D), dtype=jnp.float32)
    v = jax.random.normal(kv, (B, Sk, D), dtype=jnp.float32)
    mask = (jax.random.uniform(km, (B, Sk)) > 0.25).astype(jnp.int32)
    mask = mask.at[:, 0].set(1)  # keep at least one key unmasked per batch

    out, probs = global_attention(q, k, v, mask)
    out = jax.block_until_ready(out)
    probs = jax.block_until_ready(probs)

    ref_out, ref_probs = _reference(q, k, v, mask)
    assert out.shape == ref_out.shape and probs.shape == ref_probs.shape
    # approx EUP reciprocal in the softmax -> slightly looser tolerance than 1e-4
    assert jnp.allclose(out, ref_out, atol=2e-3, rtol=2e-3), \
        float(jnp.max(jnp.abs(out - ref_out)))
    assert jnp.allclose(probs, ref_probs, atol=2e-3, rtol=2e-3), \
        float(jnp.max(jnp.abs(probs - ref_probs)))

    print("KERNEL_OK")
</pallas_src>

<mosaic_0001>
module attributes {stable_mosaic.version = 11 : i64} {
  func.func @_global_attention_kernel(%arg0: i32, %arg1: i32, %arg2: memref<2x8x32xf32, #tpu.memory_space<vmem>>, %arg3: memref<2x128x32xf32, #tpu.memory_space<vmem>>, %arg4: memref<2x128x32xf32, #tpu.memory_space<vmem>>, %arg5: memref<2x1x128xf32, #tpu.memory_space<vmem>>, %arg6: memref<2x8x32xf32, #tpu.memory_space<vmem>>, %arg7: memref<2x8x128xf32, #tpu.memory_space<vmem>>) attributes {dimension_semantics = [#tpu.dimension_semantics<parallel>, #tpu.dimension_semantics<parallel>], iteration_bounds = array<i64: 1, 1>, scalar_prefetch = 0 : i64, scratch_operands = 0 : i64, tpu.core_type = #tpu.core_type<tc>, window_params = [{transform_indices = @transform_0, window_bounds = array<i64: 2, 8, 32>}, {transform_indices = @transform_1, window_bounds = array<i64: 2, 128, 32>}, {transform_indices = @transform_2, window_bounds = array<i64: 2, 128, 32>}, {transform_indices = @transform_3, window_bounds = array<i64: 2, 1, 128>}, {transform_indices = @transform_4, window_bounds = array<i64: 2, 8, 32>}, {transform_indices = @transform_5, window_bounds = array<i64: 2, 8, 128>}]} {
    %c0 = arith.constant 0 : index
    %c0_0 = arith.constant 0 : index
    %c0_1 = arith.constant 0 : index
    %0 = vector.load %arg2[%c0, %c0_0, %c0_1] : memref<2x8x32xf32, #tpu.memory_space<vmem>>, vector<2x8x32xf32>
    %cst = arith.constant 0.176776692 : f32
    %1 = vector.broadcast %cst : f32 to vector<2x8x32xf32>
    %2 = arith.mulf %0, %1 : vector<2x8x32xf32>
    %c0_2 = arith.constant 0 : index
    %c0_3 = arith.constant 0 : index
    %c0_4 = arith.constant 0 : index
    %3 = vector.load %arg3[%c0_2, %c0_3, %c0_4] : memref<2x128x32xf32, #tpu.memory_space<vmem>>, vector<2x128x32xf32>
    %c0_5 = arith.constant 0 : index
    %c0_6 = arith.constant 0 : index
    %c0_7 = arith.constant 0 : index
    %4 = vector.load %arg4[%c0_5, %c0_6, %c0_7] : memref<2x128x32xf32, #tpu.memory_space<vmem>>, vector<2x128x32xf32>
    %c0_8 = arith.constant 0 : index
    %c0_9 = arith.constant 0 : index
    %c0_10 = arith.constant 0 : index
    %5 = vector.load %arg5[%c0_8, %c0_9, %c0_10] : memref<2x1x128xf32, #tpu.memory_space<vmem>>, vector<2x1x128xf32>
    %cst_11 = arith.constant dense<0.000000e+00> : vector<2x8x128xf32>
    %6 = tpu.matmul %2, %3, %cst_11 {dimension_numbers = #tpu.dot_dimension_numbers<[2], [2], [1], [1], [0, 0, 0, 1, 1, 1], [0], [0]>} : vector<2x8x32xf32>, vector<2x128x32xf32>, vector<2x8x128xf32> -> vector<2x8x128xf32>
    %7 = vector.broadcast %5 : vector<2x1x128xf32> to vector<2x8x128xf32>
    %8 = arith.addf %6, %7 : vector<2x8x128xf32>
    %cst_12 = arith.constant dense<0xFF800000> : vector<2x8xf32>
    %9 = vector.multi_reduction <maximumf>, %8, %cst_12 [2] : vector<2x8x128xf32> to vector<2x8xf32>
    %10 = vector.shape_cast %9 : vector<2x8xf32> to vector<2x8x1xf32>
    %11 = vector.broadcast %10 : vector<2x8x1xf32> to vector<2x8x128xf32>
    %12 = arith.subf %8, %11 : vector<2x8x128xf32>
    %13 = math.exp %12 : vector<2x8x128xf32>
    %cst_13 = arith.constant dense<0.000000e+00> : vector<2x8xf32>
    %14 = vector.multi_reduction <add>, %13, %cst_13 [2] : vector<2x8x128xf32> to vector<2x8xf32>
    %15 = vector.shape_cast %14 : vector<2x8xf32> to vector<2x8x1xf32>
    %16 = tpu.reciprocal %15 {approx = true} : vector<2x8x1xf32> -> vector<2x8x1xf32>
    %17 = vector.broadcast %16 : vector<2x8x1xf32> to vector<2x8x128xf32>
    %18 = arith.mulf %13, %17 : vector<2x8x128xf32>
    %cst_14 = arith.constant dense<0.000000e+00> : vector<2x8x32xf32>
    %19 = tpu.matmul %18, %4, %cst_14 {dimension_numbers = #tpu.dot_dimension_numbers<[2], [1], [1], [2], [0, 0, 0, 1, 1, 2], [0], [0]>} : vector<2x8x128xf32>, vector<2x128x32xf32>, vector<2x8x32xf32> -> vector<2x8x32xf32>
    %c0_15 = arith.constant 0 : index
    %c0_16 = arith.constant 0 : index
    %c0_17 = arith.constant 0 : index
    %20 = vector.load %arg6[%c0_15, %c0_16, %c0_17] : memref<2x8x32xf32, #tpu.memory_space<vmem>>, vector<2x8x32xf32>
    tpu.vector_store %arg6[%c0_15, %c0_16, %c0_17], %19 {strides = array<i32>} : memref<2x8x32xf32, #tpu.memory_space<vmem>>, vector<2x8x32xf32>,
    %c0_18 = arith.constant 0 : index
    %c0_19 = arith.constant 0 : index
    %c0_20 = arith.constant 0 : index
    %21 = vector.load %arg7[%c0_18, %c0_19, %c0_20] : memref<2x8x128xf32, #tpu.memory_space<vmem>>, vector<2x8x128xf32>
    tpu.vector_store %arg7[%c0_18, %c0_19, %c0_20], %18 {strides = array<i32>} : memref<2x8x128xf32, #tpu.memory_space<vmem>>, vector<2x8x128xf32>,
    return
  }
  func.func @transform_0(%arg0: i32, %arg1: i32) -> (i32, i32, i32) {
    %c0_i32 = arith.constant 0 : i32
    %c0_i32_0 = arith.constant 0 : i32
    return %arg0, %arg1, %c0_i32 : i32, i32, i32
  }
  func.func @transform_1(%arg0: i32, %arg1: i32) -> (i32, i32, i32) {
    %c0_i32 = arith.constant 0 : i32
    %c0_i32_0 = arith.constant 0 : i32
    %c0_i32_1 = arith.constant 0 : i32
    return %arg0, %c0_i32, %c0_i32_0 : i32, i32, i32
  }
  func.func @transform_2(%arg0: i32, %arg1: i32) -> (i32, i32, i32) {
    %c0_i32 = arith.constant 0 : i32
    %c0_i32_0 = arith.constant 0 : i32
    %c0_i32_1 = arith.constant 0 : i32
    return %arg0, %c0_i32, %c0_i32_0 : i32, i32, i32
  }
  func.func @transform_3(%arg0: i32, %arg1: i32) -> (i32, i32, i32) {
    %c0_i32 = arith.constant 0 : i32
    %c0_i32_0 = arith.constant 0 : i32
    %c0_i32_1 = arith.constant 0 : i32
    return %arg0, %c0_i32, %c0_i32_0 : i32, i32, i32
  }
  func.func @transform_4(%arg0: i32, %arg1: i32) -> (i32, i32, i32) {
    %c0_i32 = arith.constant 0 : i32
    %c0_i32_0 = arith.constant 0 : i32
    return %arg0, %arg1, %c0_i32 : i32, i32, i32
  }
  func.func @transform_5(%arg0: i32, %arg1: i32) -> (i32, i32, i32) {
    %c0_i32 = arith.constant 0 : i32
    %c0_i32_0 = arith.constant 0 : i32
    return %arg0, %arg1, %c0_i32 : i32, i32, i32
  }
}

</mosaic_0001>

<bundles_post_ra>
// kernel: tpu_custom_call.1
= control target key start
LH: loop header
LB: loop body
LE: loop exit
PB: predicated region body
PF: predicated region fallthrough
CT: control target
= control target key end

     0   :  { %11 = vsyncpa [#allocation3], 0  ;;  %vm103_vm0 = vcmask 261120   ;;  %v959_v3 = vmov 0.0|0.0   ;;  %vm960_vm2 = vmmov 0   ;;  %v961_v8 = vmov 0.0   ;;  %s1306_s0 = inlined_call_operand.vmem [shape: f32[2,8,32], index: 0, kind: input, shape index: {}]   ;;  %s1307_s1 = inlined_call_operand.vmem [shape: f32[2,128,32], index: 1, kind: input, shape index: {}]   ;;  %s1308_s2 = inlined_call_operand.vmem [shape: f32[2,128,32], index: 2, kind: input, shape index: {}]   ;;  %s1309_s3 = inlined_call_operand.vmem [shape: f32[2,1,128], index: 3, kind: input, shape index: {}]   ;;  %s1310_s4 = inlined_call_operand.hbm [shape: f32[2,8,32], index: 4, kind: output, shape index: {0}]   ;;  %s1311_s5 = inlined_call_operand.hbm [shape: f32[2,8,128], index: 5, kind: output, shape index: {1}]  }
   0x1   :  { %v25_v0 = vld [vmem:[%s1307_s1] sm:$0xff]  ;;  %v26_v1 = vld [vmem:[%s1307_s1 + $0x8] sm:$0xff]  ;;  %784 = vmatprep.subr.bf16.mxu0 %v959_v3  ;;  %vm1008_vm1 = vmpackc.low %vm103_vm0, %vm103_vm0  ;;  %816 = vmatprep.subr.bf16.mxu1 %v959_v3 }
   0x2   :  { %v41_v2 = vld [vmem:[%s1307_s1 + $0x80] sm:$0xff]  ;;  %v785_v4 = vpack.c.bf16 %v26_v1, %v25_v0  ;;  %v42_v6 = vld [vmem:[%s1307_s1 + $0x88] sm:$0xff]  ;;  %676 = vmatprep.mubr.msk.f32.mxu0 %vm960_vm2, %v961_v8  ;;  %711 = vmatprep.mubr.msk.f32.mxu1 %vm960_vm2, %v961_v8  ;;  %v27_v9 = vld [vmem:[%s1307_s1 + $0x10] sm:$0xff] }
   0x3   :  { %v817_v7 = vpack.c.bf16 %v42_v6, %v41_v2  ;;  %v28_v10 = vld [vmem:[%s1307_s1 + $0x18] sm:$0xff]  ;;  %v43_v11 = vld [vmem:[%s1307_s1 + $0x90] sm:$0xff]  ;;  %v29_v15 = vld [vmem:[%s1307_s1 + $0x20] sm:$0xff] }
   0x4   :  { %787 = vmatpush3.bf16.xpose.msk.msra.mxu0 %vm1008_vm1, %v785_v4  ;;  %v44_v12 = vld [vmem:[%s1307_s1 + $0x98] sm:$0xff]  ;;  %v789_v13 = vpack.c.bf16 %v28_v10, %v27_v9  ;;  %v30_v16 = vld [vmem:[%s1307_s1 + $0x28] sm:$0xff] }
   0x5   :  { %819 = vmatpush3.bf16.xpose.msk.msra.mxu1 %vm1008_vm1, %v817_v7  ;;  %788 = vmatprep.subr.bf16.mxu0 %v959_v3  ;;  %v821_v14 = vpack.c.bf16 %v44_v12, %v43_v11 }
   0x6   :  { %820 = vmatprep.subr.bf16.mxu1 %v959_v3 }
   0xc   :  { %791 = vmatpush3.bf16.xpose.msk.msra.mxu0 %vm1008_vm1, %v789_v13 }
   0xd   :  { %823 = vmatpush3.bf16.xpose.msk.msra.mxu1 %vm1008_vm1, %v821_v14  ;;  %792 = vmatprep.subr.bf16.mxu0 %v959_v3 }
   0xe   :  { %12 = vsyncpa [#allocation5], 0  ;;  %824 = vmatprep.subr.bf16.mxu1 %v959_v3  ;;  %v45_v17 = vld [vmem:[%s1307_s1 + $0xa0] sm:$0xff]  ;;  %v46_v18 = vld [vmem:[%s1307_s1 + $0xa8] sm:$0xff]  ;;  %v793_v19 = vpack.c.bf16 %v30_v16, %v29_v15  ;;  %s962_s20 = smov [#allocation4]  }
   0xf   :  { %v825_v20 = vpack.c.bf16 %v46_v18, %v45_v17  ;;  %v31_v21 = vld [vmem:[%s1307_s1 + $0x30] sm:$0xff]  ;;  %v32_v22 = vld [vmem:[%s1307_s1 + $0x38] sm:$0xff]  ;;  %v33_v27 = vld [vmem:[%s1307_s1 + $0x40] sm:$0xff]  ;;  %s525_s21 = sshll.u32 %s962_s20, 4  ;;  %s526_s21 = int_to_ptr.vmem [resolvable:$true] %s525_s21 }
  0x10   :  { %v47_v23 = vld [vmem:[%s1307_s1 + $0xb0] sm:$0xff]  ;;  %v48_v24 = vld [vmem:[%s1307_s1 + $0xb8] sm:$0xff]  ;;  %v797_v25 = vpack.c.bf16 %v32_v22, %v31_v21  ;;  %v34_v28 = vld [vmem:[%s1307_s1 + $0x48] sm:$0xff]  ;;  %p916_p1 = scmp.lt.s32.totalorder %s526_s21, %s526_s21 }
  0x11   :  { %v829_v26 = vpack.c.bf16 %v48_v24, %v47_v23  ;;  %v49_v29 = vld [vmem:[%s1307_s1 + $0xc0] sm:$0xff]  ;;  %v50_v30 = vld [vmem:[%s1307_s1 + $0xc8] sm:$0xff]  ;;  %v801_v31 = vpack.c.bf16 %v34_v28, %v33_v27  ;;  %v35_v33 = vld [vmem:[%s1307_s1 + $0x50] sm:$0xff] }
  0x12   :  { %v833_v32 = vpack.c.bf16 %v50_v30, %v49_v29  ;;  %v36_v34 = vld [vmem:[%s1307_s1 + $0x58] sm:$0xff]  ;;  %v51_v35 = vld [vmem:[%s1307_s1 + $0xd0] sm:$0xff]  ;;  %v37_v39 = vld [vmem:[%s1307_s1 + $0x60] sm:$0xff] }
  0x13   :  { %v52_v36 = vld [vmem:[%s1307_s1 + $0xd8] sm:$0xff]  ;;  %v805_v37 = vpack.c.bf16 %v36_v34, %v35_v33  ;;  %v38_v40 = vld [vmem:[%s1307_s1 + $0x68] sm:$0xff]  ;;  %v53_v41 = vld [vmem:[%s1307_s1 + $0xe0] sm:$0xff] }
  0x14   :  { %795 = vmatpush3.bf16.xpose.msk.msra.mxu0 %vm1008_vm1, %v793_v19  ;;  %v837_v38 = vpack.c.bf16 %v52_v36, %v51_v35  ;;  %v54_v42 = vld [vmem:[%s1307_s1 + $0xe8] sm:$0xff]  ;;  %v809_v43 = vpack.c.bf16 %v38_v40, %v37_v39  ;;  %v39_v45 = vld [vmem:[%s1307_s1 + $0x70] sm:$0xff]  ;;  %v40_v46 = vld [vmem:[%s1307_s1 + $0x78] sm:$0xff] }
  0x15   :  { %827 = vmatpush3.bf16.xpose.msk.msra.mxu1 %vm1008_vm1, %v825_v20  ;;  %796 = vmatprep.subr.bf16.mxu0 %v959_v3  ;;  %v841_v44 = vpack.c.bf16 %v54_v42, %v53_v41  ;;  %v55_v47 = vld [vmem:[%s1307_s1 + $0xf0] sm:$0xff]  ;;  %v56_v48 = vld [vmem:[%s1307_s1 + $0xf8] sm:$0xff]  ;;  %v813_v49 = vpack.c.bf16 %v40_v46, %v39_v45  ;;  %v21_v51 = vld [vmem:[%s1306_s0] sm:$0xff] }
  0x16   :  { %828 = vmatprep.subr.bf16.mxu1 %v959_v3  ;;  %v845_v50 = vpack.c.bf16 %v56_v48, %v55_v47  ;;  %v22_v52 = vld [vmem:[%s1306_s0 + $0x8] sm:$0xff]  ;;  %v23_v53 = vmul.f32 0.17677669, %v21_v51  ;;  %v540_v55 = vld [vmem:[%s1309_s3] ss:$0 sm:$0xff]  ;;  %v59_v1 = vld [vmem:[%s1308_s2 + $0x10] sm:$0xff] }
  0x17   :  { %v24_v54 = vmul.f32 0.17677669, %v22_v52  ;;  %v541_v57 = vld [vmem:[%s1309_s3 + $0x1] ss:$0 sm:$0xff]  ;;  %v58_v0 = vld [vmem:[%s1308_s2 + $0x8] sm:$0xff]  ;;  %v60_v4 = vld [vmem:[%s1308_s2 + $0x18] sm:$0xff] }
  0x18   :  { %v57_v63 = vld [vmem:[%s1308_s2] sm:$0xff]  ;;  %v74_v6 = vld [vmem:[%s1308_s2 + $0x88] sm:$0xff]  ;;  %v852_v9 = vpack.c.bf16 %v60_v4, %v59_v1  ;;  %v76_v10 = vld [vmem:[%s1308_s2 + $0x98] sm:$0xff] }
  0x19   :  { %v849_v2 = vpack.c.bf16 %v58_v0, %v57_v63  ;;  %v73_v5 = vld [vmem:[%s1308_s2 + $0x80] sm:$0xff]  ;;  %v62_v12 = vld [vmem:[%s1308_s2 + $0x28] sm:$0xff]  ;;  %v63_v17 = vld [vmem:[%s1308_s2 + $0x30] sm:$0xff] }
  0x1a   :  { %v873_v7 = vpack.c.bf16 %v74_v6, %v73_v5  ;;  %v61_v11 = vld [vmem:[%s1308_s2 + $0x20] sm:$0xff]  ;;  %v78_v15 = vld [vmem:[%s1308_s2 + $0xa8] sm:$0xff]  ;;  %v64_v18 = vld [vmem:[%s1308_s2 + $0x38] sm:$0xff] }
  0x1b   :  { %v77_v14 = vld [vmem:[%s1308_s2 + $0xa0] sm:$0xff]  ;;  %v855_v16 = vpack.c.bf16 %v62_v12, %v61_v11  ;;  %v79_v20 = vld [vmem:[%s1308_s2 + $0xb0] sm:$0xff]  ;;  %v80_v21 = vld [vmem:[%s1308_s2 + $0xb8] sm:$0xff]  ;;  %v858_v22 = vpack.c.bf16 %v64_v18, %v63_v17 }
  0x1c   :  { %799 = vmatpush3.bf16.xpose.msk.msra.mxu0 %vm1008_vm1, %v797_v25  ;;  %v879_v19 = vpack.c.bf16 %v78_v15, %v77_v14  ;;  %v65_v23 = vld [vmem:[%s1308_s2 + $0x40] sm:$0xff]  ;;  %v66_v24 = vld [vmem:[%s1308_s2 + $0x48] sm:$0xff]  ;;  %v882_v25 = vpack.c.bf16 %v80_v21, %v79_v20  ;;  %v67_v35 = vld [vmem:[%s1308_s2 + $0x50] sm:$0xff] }
  0x1d   :  { %831 = vmatpush3.bf16.xpose.msk.msra.mxu1 %vm1008_vm1, %v829_v26  ;;  %800 = vmatprep.subr.bf16.mxu0 %v959_v3  ;;  %v861_v26 = vpack.c.bf16 %v66_v24, %v65_v23  ;;  %v68_v36 = vld [vmem:[%s1308_s2 + $0x58] sm:$0xff]  ;;  %v82_v39 = vld [vmem:[%s1308_s2 + $0xc8] sm:$0xff]  ;;  %v69_v41 = vld [vmem:[%s1308_s2 + $0x60] sm:$0xff] }
  0x1e   :  { %832 = vmatprep.subr.bf16.mxu1 %v959_v3  ;;  %v70_v42 = vld [vmem:[%s1308_s2 + $0x68] sm:$0xff]  ;;  %v84_v45 = vld [vmem:[%s1308_s2 + $0xd8] sm:$0xff]  ;;  %v71_v46 = vld [vmem:[%s1308_s2 + $0x70] sm:$0xff] }
  0x1f   :  { %v72_v47 = vld [vmem:[%s1308_s2 + $0x78] sm:$0xff] }
  0x20   :  { %v870_v51 = vpack.c.bf16 %v72_v47, %v71_v46 }
  0x24   :  { %803 = vmatpush3.bf16.xpose.msk.msra.mxu0 %vm1008_vm1, %v801_v31 }
  0x25   :  { %835 = vmatpush3.bf16.xpose.msk.msra.mxu1 %vm1008_vm1, %v833_v32  ;;  %804 = vmatprep.subr.bf16.mxu0 %v959_v3 }
  0x26   :  { %836 = vmatprep.subr.bf16.mxu1 %v959_v3 }
  0x2c   :  { %807 = vmatpush3.bf16.xpose.msk.msra.mxu0 %vm1008_vm1, %v805_v37  ;;  %v81_v37 = vld [vmem:[%s1308_s2 + $0xc0] sm:$0xff] }
  0x2d   :  { %839 = vmatpush3.bf16.xpose.msk.msra.mxu1 %vm1008_vm1, %v837_v38  ;;  %808 = vmatprep.subr.bf16.mxu0 %v959_v3  ;;  %v864_v38 = vpack.c.bf16 %v68_v36, %v67_v35  ;;  %v885_v40 = vpack.c.bf16 %v82_v39, %v81_v37 }
  0x2e   :  { %840 = vmatprep.subr.bf16.mxu1 %v959_v3 }
  0x34   :  { %811 = vmatpush3.bf16.xpose.msk.msra.mxu0 %vm1008_vm1, %v809_v43  ;;  %v83_v43 = vld [vmem:[%s1308_s2 + $0xd0] sm:$0xff] }
  0x35   :  { %843 = vmatpush3.bf16.xpose.msk.msra.mxu1 %vm1008_vm1, %v841_v44  ;;  %812 = vmatprep.subr.bf16.mxu0 %v959_v3  ;;  %v867_v44 = vpack.c.bf16 %v70_v42, %v69_v41  ;;  %v888_v48 = vpack.c.bf16 %v84_v45, %v83_v43 }
  0x36   :  { %844 = vmatprep.subr.bf16.mxu1 %v959_v3 }
  0x3c   :  { %815 = vmatpush3.bf16.xpose.msk.msra.mxu0 %vm1008_vm1, %v813_v49  ;;  %v85_v49 = vld [vmem:[%s1308_s2 + $0xe0] sm:$0xff] }
  0x3d   :  { %847 = vmatpush3.bf16.xpose.msk.msra.mxu1 %vm1008_vm1, %v845_v50  ;;  %848 = vmatprep.subr.bf16.mxu0 %v959_v3  ;;  %v86_v50 = vld [vmem:[%s1308_s2 + $0xe8] sm:$0xff] }
  0x3e   :  { %872 = vmatprep.subr.bf16.mxu1 %v959_v3  ;;  %v891_v52 = vpack.c.bf16 %v86_v50, %v85_v49 }
  0x43   :  { %677 = vmatmul.mubr.msk.f32.vlgmr.msra.gmra.mrb[0].mxu0 %vm103_vm0, %v23_v53  ;;  %v87_v53 = vld [vmem:[%s1308_s2 + $0xf0] sm:$0xff] }
  0x44   :  { %712 = vmatmul.mubr.msk.f32.vlgmr.msra.gmra.mrb[0].mxu1 %vm103_vm0, %v24_v54  ;;  %746 = vmatprep.mubr.msk.f32.mxu0 %vm960_vm2, %v961_v8  ;;  %v88_v54 = vld [vmem:[%s1308_s2 + $0xf8] sm:$0xff] }
  0x45   :  { %781 = vmatprep.mubr.msk.f32.mxu1 %vm960_vm2, %v961_v8  ;;  %v75_v8 = vld [vmem:[%s1308_s2 + $0x90] sm:$0xff]  ;;  %850 = vmatpush3.bf16.msra.mxu0 %v849_v2  ;;  %s911_s2 = scalar_lea.vmem %s526_s21, 256 }
  0x46   :  { %851 = vmatprep.subr.bf16.mxu0 %v959_v3  ;;  %874 = vmatpush3.bf16.msra.mxu1 %v873_v7  ;;  %v876_v13 = vpack.c.bf16 %v76_v10, %v75_v8  ;;  %p912_p0 = scmp.ne.s32.totalorder %s526_s21, %s911_s2  ;;  %p917_p2 = scmp.lt.s32.totalorder %s911_s2, %s911_s2 }
  0x47   :  { %875 = vmatprep.subr.bf16.mxu1 %v959_v3 }
  0x48   :  { %p918_p3 = por %p917_p2, %p916_p1 }
  0x49   :  { %853 = vmatpush3.bf16.msra.mxu0 %v852_v9 }
  0x4a   :  { %854 = vmatprep.subr.bf16.mxu0 %v959_v3  ;;  %877 = vmatpush3.bf16.msra.mxu1 %v876_v13  ;;  %p919_p4 = pnand %p918_p3, %p912_p0 }
  0x4b   :  { %878 = vmatprep.subr.bf16.mxu1 %v959_v3 }
  0x4d   :  { %856 = vmatpush3.bf16.msra.mxu0 %v855_v16 }
  0x4e   :  { %857 = vmatprep.subr.bf16.mxu0 %v959_v3  ;;  %880 = vmatpush3.bf16.msra.mxu1 %v879_v19 }
  0x4f   :  { %881 = vmatprep.subr.bf16.mxu1 %v959_v3 }
  0x51   :  { %859 = vmatpush3.bf16.msra.mxu0 %v858_v22 }
  0x52   :  { %860 = vmatprep.subr.bf16.mxu0 %v959_v3  ;;  %883 = vmatpush3.bf16.msra.mxu1 %v882_v25 }
  0x53   :  { %884 = vmatprep.subr.bf16.mxu1 %v959_v3 }
  0x55   :  { %862 = vmatpush3.bf16.msra.mxu0 %v861_v26 }
  0x56   :  { %863 = vmatprep.subr.bf16.mxu0 %v959_v3  ;;  %886 = vmatpush3.bf16.msra.mxu1 %v885_v40 }
  0x57   :  { %887 = vmatprep.subr.bf16.mxu1 %v959_v3 }
  0x59   :  { %865 = vmatpush3.bf16.msra.mxu0 %v864_v38 }
  0x5a   :  { %866 = vmatprep.subr.bf16.mxu0 %v959_v3  ;;  %889 = vmatpush3.bf16.msra.mxu1 %v888_v48 }
  0x5b   :  { %890 = vmatprep.subr.bf16.mxu1 %v959_v3 }
  0x5d   :  { %868 = vmatpush3.bf16.msra.mxu0 %v867_v44 }
  0x5e   :  { %869 = vmatprep.subr.bf16.mxu0 %v959_v3  ;;  %892 = vmatpush3.bf16.msra.mxu1 %v891_v52 }
  0x5f   :  { %893 = vmatprep.subr.bf16.mxu1 %v959_v3 }
  0x61   :  { %871 = vmatpush3.bf16.msra.mxu0 %v870_v51 }
 0x116   :  { %v221_v56 = vpop.f32.mrb[0].mxu0 }
 0x117   :  { %v222_v58 = vadd.f32 %v540_v55, %v221_v56  ;;  %v678_v59 = vpop.f32.mrb[1].mxu0  ;;  %v342_v60 = vpop.f32.mrb[0].mxu1  ;;  %v894_v55 = vpack.c.bf16 %v88_v54, %v87_v53 }
 0x118   :  { %v713_v61 = vpop.f32.mrb[1].mxu1  ;;  %v343_v62 = vadd.f32 %v541_v57, %v342_v60 }
 0x119   :  { %346 = vmax.xlane.f32.xlu0 %v222_v58  ;;  %895 = vmatpush3.bf16.msra.mxu1 %v894_v55 }
 0x11d   :  { %348 = vmax.xlane.f32.xlu0 %v343_v62 }
 0x1a6   :  { %v347_v27 = vpop.xlane.xlu0 %346 }
 0x1a7   :  { %v350_v28 = vsub.f32 %v222_v58, %v347_v27 }
 0x1a9   :  { %v352_v29 = vmul.f32 1.442695, %v350_v28 }
 0x1aa   :  { %v349_v30 = vpop.xlane.xlu0 %348 }
 0x1ab   :  { %903 = vpow2.f32 %v352_v29  ;;  %v351_v31 = vsub.f32 %v343_v62, %v349_v30 }
 0x1ad   :  { %v354_v32 = vmul.f32 1.442695, %v351_v31 }
 0x1af   :  { %905 = vpow2.f32 %v354_v32 }
 0x1b5   :  { %v904_v33 = vpop.eup %903 }
 0x1b6   :  { %356 = vadd.xlane.f32.xlu1 %v904_v33 }
 0x1b9   :  { %v906_v34 = vpop.eup %905 }
 0x1ba   :  { %358 = vadd.xlane.f32.xlu1 %v906_v34 }
 0x243   :  { %v357_v56 = vpop.xlane.xlu1 %356 }
 0x244   :  { %907 = vrcp.f32 %v357_v56 }
 0x247   :  { %v359_v57 = vpop.xlane.xlu1 %358 }
 0x248   :  { %909 = vrcp.f32 %v359_v57 }
 0x24e   :  { %v908_v58 = vpop.eup %907 }
 0x24f   :  { %v362_v59 = vmul.f32 %v908_v58, %v904_v33 }
 0x251   :  { %747 = vmatmul.mubr.f32.vlgmr.msra.gmra.mrb[2].mxu0 %v362_v59  ;;  %506 = vst [vmem:[#allocation4] sm:$0xff] %v362_v59 }
 0x252   :  { %v910_v60 = vpop.eup %909 }
 0x253   :  { %v363_v61 = vmul.f32 %v910_v60, %v906_v34 }
 0x255   :  { %782 = vmatmul.mubr.f32.vlgmr.msra.gmra.mrb[2].mxu1 %v363_v61  ;;  %507 = vst [vmem:[#allocation4 + $0x8] sm:$0xff] %v363_v61 }
 0x256   :  { %922 = shalt.err (!%p919_p4)
}
 0x257   :  { %s923_s24 = scalar_lea.hbm %s1311_s5, 256 }
 0x258   :  { %p924_p5 = scmp.ne.s32.totalorder %s1311_s5, %s923_s24  ;;  %p927_p6 = scmp.lt.u32.totalorder %s923_s24, %s1311_s5 }
 0x25a   :  { %p929_p7 = pnand %p927_p6, %p924_p5 }
 0x25c   :  { %932 = shalt.err (!%p929_p7)
}
 0x25d   :  { %s963_s29 = smov 128   ;;  %s964_s30 = smov 8  }
 0x25e   :  { %531 = dma.vmem_to_hbm [thread:$0]  %s526_s21, 256, %s1311_s5, [#allocation5], %s963_s29, %s963_s29, %s964_s30  }
 0x25f   :  { %s965_s8 = smov [#allocation2]  }
 0x260   :  { %s513_s9 = sshll.u32 %s965_s8, 4  ;;  %s514_s9 = int_to_ptr.vmem [resolvable:$true] %s513_s9 }
 0x261   :  { %s933_s10 = scalar_lea.vmem %s514_s9, 256  ;;  %p938_p9 = scmp.lt.s32.totalorder %s514_s9, %s514_s9 }
 0x262   :  { %p934_p8 = scmp.ne.s32.totalorder %s514_s9, %s933_s10  ;;  %p939_p10 = scmp.lt.s32.totalorder %s933_s10, %s933_s10 }
 0x264   :  { %p940_p11 = por %p939_p10, %p938_p9 }
 0x266   :  { %p941_p12 = pnand %p940_p11, %p934_p8 }
 0x324   :  { %v430_v3 = vpop.f32.mrb[2].mxu0 }
 0x325   :  { %504 = vst.msk [vmem:[#allocation2] sm:$0xff] %vm103_vm0, %v430_v3  ;;  %v748_v62 = vpop.f32.mrb[3].mxu0 }
 0x328   :  { %v500_v63 = vpop.f32.mrb[2].mxu1 }
 0x329   :  { %505 = vst.msk [vmem:[#allocation2 + $0x8] sm:$0xff] %vm103_vm0, %v500_v63  ;;  %v783_v0 = vpop.f32.mrb[3].mxu1 }
 0x32a   :  { %944 = shalt.err (!%p941_p12)
}
 0x32b   :  { %s945_s11 = scalar_lea.hbm %s1310_s4, 256 }
 0x32c   :  { %p946_p13 = scmp.ne.s32.totalorder %s1310_s4, %s945_s11  ;;  %p949_p0 = scmp.lt.u32.totalorder %s945_s11, %s1310_s4 }
 0x32e   :  { %p951_p1 = pnand %p949_p0, %p946_p13 }
 0x330   :  { %954 = shalt.err (!%p951_p1)
}
 0x331   :  { %519 = dma.vmem_to_hbm [thread:$0]  %s514_s9, 256, %s1310_s4, [#allocation3], %s963_s29, %s963_s29, %s964_s30  }
 0x332   :  { %955 = dma.done.wait [#allocation3], 256  }
 0x333   :  { %956 = vsyncadd [#allocation3], 4294967040 }
 0x334   :  { %957 = dma.done.wait [#allocation5], 256  }
 0x335   :  { %958 = vsyncadd [#allocation5], 4294967040 }
 0x336   :  { %538 = vsyncpa [#allocation3], 1 }
 0x337   :  { %539 = vsyncpa [#allocation5], 1 }

</bundles_post_ra>
